<compile_context>
chip_gen: v7x
topology: tpu7x:2x2x1
jax: 0.10.0
libtpu: 0.0.40
codegen_flags: <defaults>
</compile_context>

<pallas_src>
import functools

import numpy as np
import jax
import jax.numpy as jnp
from jax import lax
from jax.experimental import pallas as pl
from jax.experimental.pallas import tpu as pltpu


def _round_up(x, m):
    return (x + m - 1) // m * m


def _plan_tiles(n_rows, d, itemsize):
    """Pick (num_parts, steps, block_rows, n_blocks) for the N-tiled reduction."""
    # Keep 2 streamed (block_rows, D) inputs x 2 pipeline buffers under ~8 MiB:
    # fits v5e's 16 MiB default scoped VMEM and leaves headroom on v7x (64 MiB).
    budget_bytes = 8 * 1024 * 1024
    cap = max(16, (budget_bytes // (4 * max(d, 1) * itemsize)) // 16 * 16)
    # Two partial reductions: on v7x the 'parallel' axis is split across the two
    # TensorCores; on v5e/v6e (1 TC) it is just a short outer loop.
    num_parts = 2 if n_rows >= 32 else 1
    block_rows = min(cap, 2048, _round_up(pl.cdiv(n_rows, num_parts), 16))
    block_rows = max(block_rows, 8)          # sublane alignment (f32: 8, bf16: 16)
    n_blocks = pl.cdiv(n_rows, block_rows)
    steps = pl.cdiv(n_blocks, num_parts)
    return num_parts, steps, block_rows, n_blocks


def _cutoff_mse_kernel(cutoff, n_rows, block_rows,
                       yp_ref, y_ref, var_ref,
                       gram_ref, cnt_ref,
                       acc_ref, cntv_ref):
    """grid = (parts, steps): part p accumulates a partial Gram over its slice
    of the sample axis; the inner 'steps' axis is the pipelined reduction."""
    p = pl.program_id(0)
    i = pl.program_id(1)
    steps = pl.num_programs(1)

    @pl.when(i == 0)
    def _init():
        acc_ref[...] = jnp.zeros_like(acc_ref)
        cntv_ref[...] = jnp.zeros_like(cntv_ref)

    # Global block index handled this step. The index_map clamps what it DMAs
    # for phantom trailing iterations; rows are computed *unclamped* here so
    # those iterations (and the ragged tail of the last real block) mask to 0.
    gb = p * steps + i
    row = gb * block_rows + lax.broadcasted_iota(jnp.int32, (block_rows, 1), 0)

    # 1) Filtering: keep sample iff noise variance <= cutoff and the row is real.
    keep = (row < n_rows) & (var_ref[...].astype(jnp.float32) <= cutoff)  # (TN,1)

    # 2) Residuals in f32 (inputs may be streamed as bf16 to halve HBM bytes).
    #    jnp.where (not multiply) so garbage in padded edge blocks cannot leak
    #    as NaN/Inf into the accumulator.
    diff = jnp.where(
        keep,
        yp_ref[...].astype(jnp.float32) - y_ref[...].astype(jnp.float32),
        0.0)                                                              # (TN,D)

    # diff^T @ diff on the MXU (contract the sample axis), f32 accumulation.
    acc_ref[...] += lax.dot_general(
        diff, diff, (((0,), (0,)), ((), ())),
        preferred_element_type=jnp.float32)

    # Survivor count: per-row VPU accumulate, single reduce at the end.
    cntv_ref[...] += keep.astype(jnp.float32)

    @pl.when(i == steps - 1)
    def _finish():
        gram_ref[...] = acc_ref[...]
        cnt_ref[...] = jnp.sum(cntv_ref[...], keepdims=True)


@functools.partial(jax.jit, static_argnames=("cutoff_value",))
def cutoff_mse_device(y_pred, y, lbl_var, cutoff_value=1.0):
    """Device-side CutoffMSE: returns (loss, kept_count) with no host sync.

    loss is the (D, D) normalized Gram matrix of the filtered residuals
    (all-zeros if nothing survives; callers mask with jnp.where(count > 0, ...)).
    """
    n, d = y_pred.shape
    assert y.shape == (n, d)
    var2d = lbl_var.reshape(n, 1)                    # keep native dtype (no upcast)

    num_parts, steps, block_rows, n_blocks = _plan_tiles(
        n, d, jnp.dtype(y_pred.dtype).itemsize)

    def row_map(p, i):
        # Clamp so trailing phantom iterations re-read the last real block;
        # their rows are masked out inside the kernel.
        return (jnp.minimum(p * steps + i, n_blocks - 1), 0)

    kernel = functools.partial(
        _cutoff_mse_kernel, float(cutoff_value), int(n), int(block_rows))

    gram_parts, cnt_parts = pl.pallas_call(
        kernel,
        grid=(num_parts, steps),
        in_specs=[
            pl.BlockSpec((block_rows, d), row_map),
            pl.BlockSpec((block_rows, d), row_map),
            pl.BlockSpec((block_rows, 1), row_map),
        ],
        out_specs=(
            pl.BlockSpec((None, d, d), lambda p, i: (p, 0, 0)),
            pl.BlockSpec((None, 1, 1), lambda p, i: (p, 0, 0)),
        ),
        out_shape=(
            jax.ShapeDtypeStruct((num_parts, d, d), jnp.float32),
            jax.ShapeDtypeStruct((num_parts, 1, 1), jnp.float32),
        ),
        scratch_shapes=[
            pltpu.VMEM((d, d), jnp.float32),          # Gram accumulator
            pltpu.VMEM((block_rows, 1), jnp.float32), # per-row count accumulator
        ],
        compiler_params=pltpu.CompilerParams(
            dimension_semantics=("parallel", "arbitrary"),
            vmem_limit_bytes=48 * 1024 * 1024),
    )(y_pred, y, var2d)

    cnt = jnp.sum(cnt_parts)
    gram = jnp.sum(gram_parts, axis=0)
    loss = gram / jnp.maximum(cnt, 1.0)   # normalize once, outside the hot loop
    return loss, cnt


def cutoff_mse(y_pred, y, lbl_var, cutoff_value=1.0):
    """Drop-in equivalent of PyTorch CutoffMSE.forward.

    Returns the (D, D) loss matrix, or the string 'cutoffMSE:NO_LOSS' if every
    sample is filtered out.  The int(cnt) below is the only host sync (needed
    only to reproduce the Python-string sentinel); training loops should call
    cutoff_mse_device directly and mask on the returned count.
    """
    if y_pred.shape[0] == 0:
        return 'cutoffMSE:NO_LOSS'
    loss, cnt = cutoff_mse_device(y_pred, y, lbl_var, cutoff_value=cutoff_value)
    if int(cnt) == 0:
        return 'cutoffMSE:NO_LOSS'
    return loss


if __name__ == "__main__":
    key = jax.random.PRNGKey(0)
    k1, k2, k3 = jax.random.split(key, 3)

    # samples x features; N deliberately NOT a multiple of the row tile so the
    # ragged-edge masking and the 2-part split both get exercised.
    N, D = 50, 8
    y_pred = jax.random.normal(k1, (N, D), dtype=jnp.float32)
    y = jax.random.normal(k2, (N, D), dtype=jnp.float32)
    # Variances in [0, 2): roughly half survive the cutoff of 1.
    lbl_var = jax.random.uniform(k3, (N,), dtype=jnp.float32,
                                 minval=0.0, maxval=2.0)

    out = cutoff_mse(y_pred, y, lbl_var, cutoff_value=1.0)

    # Pure-numpy reference with actual row removal (dynamic shape on host).
    yp_n, y_n, v_n = (np.asarray(a) for a in (y_pred, y, lbl_var))
    keep = v_n <= 1.0
    if keep.sum() == 0:
        assert out == 'cutoffMSE:NO_LOSS'
    else:
        out = jax.block_until_ready(out)
        dn = (yp_n - y_n)[keep]
        ref = dn.T @ dn / dn.shape[0]
        assert out.shape == (D, D)
        np.testing.assert_allclose(np.asarray(out), ref, atol=1e-3, rtol=1e-3)

    print("KERNEL_OK")
</pallas_src>

<mosaic_0001>
module attributes {stable_mosaic.version = 11 : i64} {
  func.func @_cutoff_mse_kernel(%arg0: i32, %arg1: i32, %arg2: memref<32x8xf32, #tpu.memory_space<vmem>>, %arg3: memref<32x8xf32, #tpu.memory_space<vmem>>, %arg4: memref<32x1xf32, #tpu.memory_space<vmem>>, %arg5: memref<1x8x8xf32, #tpu.memory_space<vmem>>, %arg6: memref<1x1x1xf32, #tpu.memory_space<vmem>>, %arg7: memref<8x8xf32, #tpu.memory_space<vmem>>, %arg8: memref<32x1xf32, #tpu.memory_space<vmem>>) attributes {dimension_semantics = [#tpu.dimension_semantics<parallel>, #tpu.dimension_semantics<arbitrary>], iteration_bounds = array<i64: 2, 1>, scalar_prefetch = 0 : i64, scratch_operands = 2 : i64, tpu.core_type = #tpu.core_type<tc>, window_params = [{transform_indices = @transform_0, window_bounds = array<i64: 32, 8>}, {transform_indices = @transform_1, window_bounds = array<i64: 32, 8>}, {transform_indices = @transform_2, window_bounds = array<i64: 32, 1>}, {transform_indices = @transform_3, window_bounds = array<i64: 1, 8, 8>}, {transform_indices = @transform_4, window_bounds = array<i64: 1, 1, 1>}]} {
    %c0_i32 = arith.constant 0 : i32
    %0 = arith.cmpi eq, %arg1, %c0_i32 : i32
    %1 = arith.extui %0 : i1 to i32
    %c0_i32_0 = arith.constant 0 : i32
    %2 = arith.cmpi ne, %1, %c0_i32_0 : i32
    scf.if %2 {
      %cst_18 = arith.constant 0.000000e+00 : f32
      %34 = vector.broadcast %cst_18 : f32 to vector<8x8xf32>
      %c0_19 = arith.constant 0 : index
      %c0_20 = arith.constant 0 : index
      %35 = vector.load %arg7[%c0_19, %c0_20] : memref<8x8xf32, #tpu.memory_space<vmem>>, vector<8x8xf32>
      tpu.vector_store %arg7[%c0_19, %c0_20], %34 {strides = array<i32>} : memref<8x8xf32, #tpu.memory_space<vmem>>, vector<8x8xf32>,
      %cst_21 = arith.constant 0.000000e+00 : f32
      %36 = vector.broadcast %cst_21 : f32 to vector<32x1xf32>
      %c0_22 = arith.constant 0 : index
      %c0_23 = arith.constant 0 : index
      %37 = vector.load %arg8[%c0_22, %c0_23] : memref<32x1xf32, #tpu.memory_space<vmem>>, vector<32x1xf32>
      tpu.vector_store %arg8[%c0_22, %c0_23], %36 {strides = array<i32>} : memref<32x1xf32, #tpu.memory_space<vmem>>, vector<32x1xf32>,
    } else {
    }
    %c1_i32 = arith.constant 1 : i32
    %3 = arith.muli %arg0, %c1_i32 : i32
    %4 = arith.addi %3, %arg1 : i32
    %c32_i32 = arith.constant 32 : i32
    %5 = arith.muli %4, %c32_i32 : i32
    %6 = tpu.iota {dimensions = array<i32: 0>} : vector<32x1xi32>
    %7 = vector.broadcast %5 : i32 to vector<32x1xi32>
    %8 = arith.addi %7, %6 : vector<32x1xi32>
    %c50_i32 = arith.constant 50 : i32
    %9 = vector.broadcast %c50_i32 : i32 to vector<32x1xi32>
    %10 = arith.cmpi slt, %8, %9 : vector<32x1xi32>
    %c0 = arith.constant 0 : index
    %c0_1 = arith.constant 0 : index
    %11 = vector.load %arg4[%c0, %c0_1] : memref<32x1xf32, #tpu.memory_space<vmem>>, vector<32x1xf32>
    %cst = arith.constant 1.000000e+00 : f32
    %12 = vector.broadcast %cst : f32 to vector<32x1xf32>
    %13 = arith.cmpf ole, %11, %12 : vector<32x1xf32>
    %14 = arith.andi %10, %13 : vector<32x1xi1>
    %c0_2 = arith.constant 0 : index
    %c0_3 = arith.constant 0 : index
    %15 = vector.load %arg2[%c0_2, %c0_3] : memref<32x8xf32, #tpu.memory_space<vmem>>, vector<32x8xf32>
    %c0_4 = arith.constant 0 : index
    %c0_5 = arith.constant 0 : index
    %16 = vector.load %arg3[%c0_4, %c0_5] : memref<32x8xf32, #tpu.memory_space<vmem>>, vector<32x8xf32>
    %17 = arith.subf %15, %16 : vector<32x8xf32>
    %cst_6 = arith.constant 0.000000e+00 : f32
    %18 = vector.shape_cast %14 : vector<32x1xi1> to vector<32x1xi1>
    %19 = vector.broadcast %18 : vector<32x1xi1> to vector<32x8xi1>
    %20 = vector.broadcast %cst_6 : f32 to vector<32x8xf32>
    %21 = arith.select %19, %17, %20 : vector<32x8xi1>, vector<32x8xf32>
    %c0_7 = arith.constant 0 : index
    %c0_8 = arith.constant 0 : index
    %22 = vector.load %arg7[%c0_7, %c0_8] : memref<8x8xf32, #tpu.memory_space<vmem>>, vector<8x8xf32>
    %cst_9 = arith.constant dense<0.000000e+00> : vector<8x8xf32>
    %23 = tpu.matmul %21, %21, %cst_9 {dimension_numbers = #tpu.dot_dimension_numbers<[0], [0], [1], [1], [0, 1, 1, 1], [], []>} : vector<32x8xf32>, vector<32x8xf32>, vector<8x8xf32> -> vector<8x8xf32>
    %24 = arith.addf %22, %23 : vector<8x8xf32>
    %c0_10 = arith.constant 0 : index
    %c0_11 = arith.constant 0 : index
    %25 = vector.load %arg7[%c0_10, %c0_11] : memref<8x8xf32, #tpu.memory_space<vmem>>, vector<8x8xf32>
    tpu.vector_store %arg7[%c0_10, %c0_11], %24 {strides = array<i32>} : memref<8x8xf32, #tpu.memory_space<vmem>>, vector<8x8xf32>,
    %c0_12 = arith.constant 0 : index
    %c0_13 = arith.constant 0 : index
    %26 = vector.load %arg8[%c0_12, %c0_13] : memref<32x1xf32, #tpu.memory_space<vmem>>, vector<32x1xf32>
    %27 = arith.extui %14 : vector<32x1xi1> to vector<32x1xi32>
    %28 = arith.sitofp %27 : vector<32x1xi32> to vector<32x1xf32>
    %29 = arith.addf %26, %28 : vector<32x1xf32>
    %c0_14 = arith.constant 0 : index
    %c0_15 = arith.constant 0 : index
    %30 = vector.load %arg8[%c0_14, %c0_15] : memref<32x1xf32, #tpu.memory_space<vmem>>, vector<32x1xf32>
    tpu.vector_store %arg8[%c0_14, %c0_15], %29 {strides = array<i32>} : memref<32x1xf32, #tpu.memory_space<vmem>>, vector<32x1xf32>,
    %c0_i32_16 = arith.constant 0 : i32
    %31 = arith.cmpi eq, %arg1, %c0_i32_16 : i32
    %32 = arith.extui %31 : i1 to i32
    %c0_i32_17 = arith.constant 0 : i32
    %33 = arith.cmpi ne, %32, %c0_i32_17 : i32
    scf.if %33 {
      %c0_18 = arith.constant 0 : index
      %c0_19 = arith.constant 0 : index
      %34 = vector.load %arg7[%c0_18, %c0_19] : memref<8x8xf32, #tpu.memory_space<vmem>>, vector<8x8xf32>
      %c0_20 = arith.constant 0 : index
      %c0_21 = arith.constant 0 : index
      %c0_22 = arith.constant 0 : index
      %35 = vector.load %arg5[%c0_20, %c0_21, %c0_22] : memref<1x8x8xf32, #tpu.memory_space<vmem>>, vector<1x8x8xf32>
      %36 = vector.shape_cast %35 : vector<1x8x8xf32> to vector<8x8xf32>
      %37 = vector.shape_cast %34 : vector<8x8xf32> to vector<1x8x8xf32>
      tpu.vector_store %arg5[%c0_20, %c0_21, %c0_22], %37 {strides = array<i32>} : memref<1x8x8xf32, #tpu.memory_space<vmem>>, vector<1x8x8xf32>,
      %c0_23 = arith.constant 0 : index
      %c0_24 = arith.constant 0 : index
      %38 = vector.load %arg8[%c0_23, %c0_24] : memref<32x1xf32, #tpu.memory_space<vmem>>, vector<32x1xf32>
      %39 = vector.shape_cast %38 : vector<32x1xf32> to vector<1x32x1xf32>
      %cst_25 = arith.constant dense<0.000000e+00> : vector<1xf32>
      %40 = vector.multi_reduction <add>, %39, %cst_25 [1, 2] : vector<1x32x1xf32> to vector<1xf32>
      %41 = vector.shape_cast %40 : vector<1xf32> to vector<1x1x1xf32>
      %42 = vector.extract %41[0, 0, 0] : f32 from vector<1x1x1xf32>
      %43 = vector.broadcast %42 : f32 to vector<1x1xf32>
      %c0_26 = arith.constant 0 : index
      %c0_27 = arith.constant 0 : index
      %c0_28 = arith.constant 0 : index
      %44 = vector.load %arg6[%c0_26, %c0_27, %c0_28] : memref<1x1x1xf32, #tpu.memory_space<vmem>>, vector<1x1x1xf32>
      %45 = vector.shape_cast %44 : vector<1x1x1xf32> to vector<1x1xf32>
      %46 = vector.shape_cast %43 : vector<1x1xf32> to vector<1x1x1xf32>
      tpu.vector_store %arg6[%c0_26, %c0_27, %c0_28], %46 {strides = array<i32>} : memref<1x1x1xf32, #tpu.memory_space<vmem>>, vector<1x1x1xf32>,
    } else {
    }
    return
  }
  func.func @transform_0(%arg0: i32, %arg1: i32) -> (i32, i32) {
    %c1_i32 = arith.constant 1 : i32
    %0 = arith.muli %arg0, %c1_i32 : i32
    %1 = arith.addi %0, %arg1 : i32
    %c1_i32_0 = arith.constant 1 : i32
    %2 = arith.minsi %1, %c1_i32_0 : i32
    %c0_i32 = arith.constant 0 : i32
    %c0_i32_1 = arith.constant 0 : i32
    return %2, %c0_i32 : i32, i32
  }
  func.func @transform_1(%arg0: i32, %arg1: i32) -> (i32, i32) {
    %c1_i32 = arith.constant 1 : i32
    %0 = arith.muli %arg0, %c1_i32 : i32
    %1 = arith.addi %0, %arg1 : i32
    %c1_i32_0 = arith.constant 1 : i32
    %2 = arith.minsi %1, %c1_i32_0 : i32
    %c0_i32 = arith.constant 0 : i32
    %c0_i32_1 = arith.constant 0 : i32
    return %2, %c0_i32 : i32, i32
  }
  func.func @transform_2(%arg0: i32, %arg1: i32) -> (i32, i32) {
    %c1_i32 = arith.constant 1 : i32
    %0 = arith.muli %arg0, %c1_i32 : i32
    %1 = arith.addi %0, %arg1 : i32
    %c1_i32_0 = arith.constant 1 : i32
    %2 = arith.minsi %1, %c1_i32_0 : i32
    %c0_i32 = arith.constant 0 : i32
    %c0_i32_1 = arith.constant 0 : i32
    return %2, %c0_i32 : i32, i32
  }
  func.func @transform_3(%arg0: i32, %arg1: i32) -> (i32, i32, i32) {
    %c0_i32 = arith.constant 0 : i32
    %c0_i32_0 = arith.constant 0 : i32
    %c0_i32_1 = arith.constant 0 : i32
    return %arg0, %c0_i32, %c0_i32_0 : i32, i32, i32
  }
  func.func @transform_4(%arg0: i32, %arg1: i32) -> (i32, i32, i32) {
    %c0_i32 = arith.constant 0 : i32
    %c0_i32_0 = arith.constant 0 : i32
    %c0_i32_1 = arith.constant 0 : i32
    return %arg0, %c0_i32, %c0_i32_0 : i32, i32, i32
  }
}

</mosaic_0001>

<bundles_post_ra>
// kernel: cutoff_mse_device.1
= control target key start
LH: loop header
LB: loop body
LE: loop exit
PB: predicated region body
PF: predicated region fallthrough
CT: control target
= control target key end

     0   :  { %s859_s15 = smov 0   ;;  %s861_s16 = smov 0   ;;  %s944_s0 = inlined_call_operand.vmem [shape: f32[50,8], index: 0, kind: input, shape index: {}]   ;;  %s945_s1 = inlined_call_operand.vmem [shape: f32[50,8], index: 1, kind: input, shape index: {}]   ;;  %s946_s2 = inlined_call_operand.vmem [shape: f32[50,1], index: 2, kind: input, shape index: {}]   ;;  %s947_s3 = inlined_call_operand.vmem [shape: f32[2,8,8], index: 3, kind: output, shape index: {0}]   ;;  %s948_s4 = inlined_call_operand.vmem [shape: f32[2,1,1], index: 4, kind: output, shape index: {1}]  }
   0x1   :  { %s863_s17 = smov 0  }
   0x2 LB: > { %s27_s18 = sadd.s32 1, %s824_s16  ;;  %p730_p0 = scmp.ge.s32.totalorder %s828_s17, 1  ;;  %s828_s17 = sphi %s863_s17, %s15_s17   ;;  %s824_s16 = sphi %s861_s16, %s950_s16   ;;  %s820_s15 = sphi %s859_s15, %s949_s15  }
   0x3   : > { %p29_p1 = scmp.ge.s32.totalorder %s27_s18, 2  ;;  %p260_p2 = scmp.lt.s32.totalorder %s828_s17, 3 }
   0x5   : > { %s952_s18 = smov (%p29_p1, %s27_s18), 0  ;;  %p261_p3 = pnand %p730_p0, %p260_p2 }
   0x6   : > { %p320_p4 = scmp.lt.s32.totalorder (!%p261_p3), %s820_s15, 1  ;;  %vm392_vm0 = vcmask (!%p261_p3), 7168   ;;  %s738_s19 = sshll.u32 (!%p261_p3), %s820_s15, 5  ;;  %v399_v0 = vlaneseq (!%p261_p3)  ;;  %v830_v1 = vmov (!%p261_p3), 0   ;;  %v831_v2 = vmov (!%p261_p3), 0.0  }
   0x7   : > { %264 = sbr.rel (%p261_p3) target bundleno = 507 (0x1fb), region = 32  ;;  %804 = vset.pattern.permute.xlu0 (!%p261_p3), %v830_v1  ;;  %393 = vst.msk [vmem:[#allocation3] sm:$0xff] (!%p261_p3), %vm392_vm0, %v831_v2  ;;  %394 = vst.msk [vmem:[#allocation3 + $0x8] sm:$0xff] (!%p261_p3), %vm392_vm0, %v831_v2  ;;  %805 = vset.pattern.permute.xlu1 (!%p261_p3), %v830_v1  ;;  %v404_v4 = vstv (!%p261_p3), %s738_s19  ;;  %v832_v32 = vmov (!%p261_p3), 0.0|0.0   ;;  %vm833_vm13 = vmmov (!%p261_p3), 0  }
   0x8   : > { %395 = vst.msk [vmem:[#allocation3 + $0x10] sm:$0xff] (!%p261_p3), %vm392_vm0, %v831_v2  ;;  %396 = vst.msk [vmem:[#allocation3 + $0x18] sm:$0xff] (!%p261_p3), %vm392_vm0, %v831_v2  ;;  %v400_v3 = vshrl.u32 (!%p261_p3), %v399_v0, 7  ;;  %766 = vmatprep.subr.bf16.mxu0 (!%p261_p3), %v832_v32  ;;  %763 = vmatprep.mubr.msk.f32.mxu0 (!%p261_p3), %vm833_vm13, %v831_v2 }
   0xa   : > { %v402_v5 = vadd.s32 (!%p261_p3), 16, %v400_v3  ;;  %v401_v6 = vadd.s32 (!%p261_p3), 8, %v400_v3  ;;  %v403_v7 = vadd.s32 (!%p261_p3), 24, %v400_v3  ;;  %v405_v8 = vadd.s32 (!%p261_p3), %v404_v4, %v400_v3 }
   0xc   : > { %v407_v9 = vadd.s32 (!%p261_p3), %v404_v4, %v402_v5  ;;  %v406_v10 = vadd.s32 (!%p261_p3), %v404_v4, %v401_v6  ;;  %v408_v11 = vadd.s32 (!%p261_p3), %v404_v4, %v403_v7  ;;  %vm409_vm1 = vcmp.lt.s32.totalorder (!%p261_p3), %v405_v8, 50 }
   0xe   : > { %s954_s15 = smov (!%p320_p4, %s820_s15), 1  ;;  %vm411_vm2 = vcmp.lt.s32.totalorder %v407_v9, 50  ;;  %v571_v15 = vld [vmem:[#allocation3] sm:$0xff]  ;;  %vm410_vm5 = vcmp.lt.s32.totalorder %v406_v10, 50  ;;  %vm412_vm8 = vcmp.lt.s32.totalorder %v408_v11, 50  ;;  %v572_v20 = vld [vmem:[#allocation3 + $0x8] sm:$0xff] }
   0xf   : > { %s731_s20 = sshll.u32 %s954_s15, 2  ;;  %v573_v17 = vld [vmem:[#allocation3 + $0x10] sm:$0xff]  ;;  %v574_v24 = vld [vmem:[#allocation3 + $0x18] sm:$0xff]  ;;  %s385_s8 = scalar_lea.vmem %s948_s4, %s954_s15 }
  0x10   : > { %p327_p5 = scmp.lt.s32.totalorder %s731_s20, 6  ;;  %s737_s9 = sshll.u32 %s954_s15, 3 }
  0x11   : > { %s382_s12 = scalar_lea.vmem %s947_s3, %s737_s9 }
  0x12   : > { %s956_s20 = smov (!%p327_p5, %s731_s20), 6 }
  0x13   : > { %s888_s21 = sshll.u32 %s956_s20, 3 }
  0x14   : > { %s370_s24 = scalar_lea.vmem %s946_s2, %s888_s21  ;;  %s330_s27 = scalar_lea.vmem %s944_s0, %s888_s21 }
  0x15   : > { %v413_v12 = vld [vmem:[%s370_s24] sm:$0xff]  ;;  %v415_v13 = vld [vmem:[%s370_s24 + $0x10] sm:$0xff]  ;;  %v414_v14 = vld [vmem:[%s370_s24 + $0x8] sm:$0xff]  ;;  %s350_s30 = scalar_lea.vmem %s945_s1, %s888_s21 }
  0x16   : > { %vm417_vm3 = vcmp.le.f32.partialorder %v413_v12, 1.0  ;;  %vm419_vm4 = vcmp.le.f32.partialorder %v415_v13, 1.0  ;;  %vm418_vm6 = vcmp.le.f32.partialorder %v414_v14, 1.0  ;;  %v416_v16 = vld [vmem:[%s370_s24 + $0x18] sm:$0xff]  ;;  %v425_v33 = vld [vmem:[%s330_s27] sm:$0xff]  ;;  %v426_v35 = vld [vmem:[%s330_s27 + $0x8] sm:$0xff] }
  0x17   : > { %vm421_vm7 = vmand %vm409_vm1, %vm417_vm3  ;;  %vm420_vm9 = vcmp.le.f32.partialorder %v416_v16, 1.0  ;;  %v429_v34 = vld [vmem:[%s350_s30] sm:$0xff]  ;;  %v430_v36 = vld [vmem:[%s350_s30 + $0x8] sm:$0xff] }
  0x18   : > { %v437_v18 = vsel %vm421_vm7, 1, %v830_v1  ;;  %v744_v19 = vsel %vm421_vm7, 1.0, %v831_v2  ;;  %vm423_vm10 = vmand %vm411_vm2, %vm419_vm4  ;;  %v433_v37 = vsub.f32 %v425_v33, %v429_v34  ;;  %v427_v38 = vld [vmem:[%s330_s27 + $0x10] sm:$0xff]  ;;  %v434_v39 = vsub.f32 %v426_v35, %v430_v36  ;;  %v428_v42 = vld [vmem:[%s330_s27 + $0x18] sm:$0xff] }
  0x19   : > { %v579_v21 = vadd.f32 %v744_v19, %v571_v15  ;;  %442 = vperm.xlu0 %804, %v437_v18   ;;  %v439_v22 = vsel %vm423_vm10, 1, %v830_v1  ;;  %v746_v23 = vsel %vm423_vm10, 1.0, %v831_v2  ;;  %vm422_vm11 = vmand %vm410_vm5, %vm418_vm6  ;;  %v431_v41 = vld [vmem:[%s350_s30 + $0x10] sm:$0xff]  ;;  %v432_v43 = vld [vmem:[%s350_s30 + $0x18] sm:$0xff]  ;;  %vm390_vm5 = vcmask 64512  }
  0x1a   : > { %v581_v25 = vadd.f32 %v746_v23, %v573_v17  ;;  %448 = vperm.xlu1 %805, %v439_v22   ;;  %v438_v26 = vsel %vm422_vm11, 1, %v830_v1  ;;  %v745_v27 = vsel %vm422_vm11, 1.0, %v831_v2  ;;  %vm424_vm12 = vmand %vm412_vm8, %vm420_vm9  ;;  %v435_v46 = vsub.f32 %v427_v38, %v431_v41  ;;  %391 = vst.msk [vmem:[#allocation2] sm:$0xff] %vm390_vm5, %v831_v2 }
  0x1b   : > { %584 = vst.msk [vmem:[#allocation3] sm:$0xff] %vm392_vm0, %v579_v21  ;;  %v580_v28 = vadd.f32 %v745_v27, %v572_v20  ;;  %v440_v29 = vsel %vm424_vm12, 1, %v830_v1  ;;  %v747_v30 = vsel %vm424_vm12, 1.0, %v831_v2  ;;  %v767_v47 = vpack.c.bf16 %v434_v39, %v433_v37 }
  0x1c   : > { %586 = vst.msk [vmem:[#allocation3 + $0x10] sm:$0xff] %vm392_vm0, %v581_v25  ;;  %v582_v31 = vadd.f32 %v747_v30, %v574_v24  ;;  %v436_v48 = vsub.f32 %v428_v42, %v432_v43  ;;  %vm494_vm6 = vcmask 261120  }
  0x1d   : > { %585 = vst.msk [vmem:[#allocation3 + $0x8] sm:$0xff] %vm392_vm0, %v580_v28  ;;  %445 = vperm.xlu0 %804, %v438_v26  }
  0x1e   : > { %587 = vst.msk [vmem:[#allocation3 + $0x18] sm:$0xff] %vm392_vm0, %v582_v31  ;;  %451 = vperm.xlu1 %805, %v440_v29   ;;  %v771_v60 = vpack.c.bf16 %v436_v48, %v435_v46 }
  0x21   : > { %v461_v2 = vld [vmem:[#allocation2] sm:$0xff] }
  0x22   : > { %v593_v50 = vld [vmem:[#allocation3] sm:$0xff] }
  0x23   : > { %v595_v52 = vld [vmem:[#allocation3 + $0x10] sm:$0xff]  ;;  %v597_v55 = vsel %vm392_vm0, %v593_v50, 0.0 }
  0x24   : > { %v594_v51 = vld [vmem:[#allocation3 + $0x8] sm:$0xff]  ;;  %v600_v57 = vsel %vm392_vm0, %v595_v52, 0.0 }
  0x25   : > { %v596_v54 = vld [vmem:[#allocation3 + $0x18] sm:$0xff]  ;;  %v598_v56 = vsel %vm392_vm0, %v594_v51, 0.0 }
  0x26   : > { %v599_v59 = vadd.f32 %v598_v56, %v597_v55  ;;  %v602_v61 = vsel %vm392_vm0, %v596_v54, 0.0  ;;  %vm614_vm0 = vcmask 0  }
  0x28   : > { %v601_v63 = vadd.f32 %v600_v57, %v599_v59 }
  0x2a   : > { %v603_v0 = vadd.f32 %v602_v61, %v601_v63 }
  0x42   : > { %604 = vadd.xlane.f32.xlu1 %v603_v0 }
  0x98   : > { %v443_v40 = vpop.permute.xlu0 %442 }
  0x99   : > { %vm453_vm14 = vcmp.eq.s32.totalorder %v443_v40, 1  ;;  %v449_v44 = vpop.permute.xlu1 %448 }
  0x9a   : > { %v457_v45 = vsel %vm453_vm14, %v433_v37, 0.0  ;;  %vm455_vm15 = vcmp.eq.s32.totalorder %v449_v44, 1 }
  0x9b   : > { %462 = vxpose.xlu0.b32.start [1/4] (short) (narrow) %v457_v45, 8  ;;  %v459_v62 = vsel %vm455_vm15, %v435_v46, 0.0 }
  0x9c   : > { %v446_v49 = vpop.permute.xlu0 %445 }
  0x9d   : > { %vm454_vm1 = vcmp.eq.s32.totalorder %v446_v49, 1  ;;  %v452_v53 = vpop.permute.xlu1 %451 }
  0x9e   : > { %v458_v58 = vsel %vm454_vm1, %v434_v39, 0.0  ;;  %vm768_vm2 = vmpackc.low %vm454_vm1, %vm453_vm14  ;;  %vm456_vm3 = vcmp.eq.s32.totalorder %v452_v53, 1 }
  0x9f   : > { %769 = vmatpush3.bf16.msk.msra.mxu0 %vm768_vm2, %v767_v47  ;;  %463 = vxpose.xlu0.b32.cont [2/4] (short) (narrow) %v458_v58, 8  ;;  %vm772_vm4 = vmpackc.low %vm456_vm3, %vm455_vm15  ;;  %v460_v1 = vsel %vm456_vm3, %v436_v48, 0.0 }
  0xa0   : > { %770 = vmatprep.subr.bf16.mxu0 %v832_v32 }
  0xa3   : > { %773 = vmatpush3.bf16.msk.msra.mxu0 %vm772_vm4, %v771_v60  ;;  %464 = vxpose.xlu0.b32.cont [3/4] (short) (narrow) %v459_v62, 8 }
  0xa7   : > { %465 = vxpose.xlu0.b32.end [4/4] (short) (narrow) %v460_v1, 8 }
  0xcf   : > { %v605_v4 = vpop.xlane.xlu1 %604 }
  0xd0   : > { %v606_v5 = vrot.slane %v605_v4, 4 }
  0xd2   : > { %v607_v6 = vadd.f32 %v606_v5, %v605_v4 }
  0xd4   : > { %v608_v7 = vrot.slane %v607_v6, 2 }
  0xd6   : > { %v609_v8 = vadd.f32 %v608_v7, %v607_v6 }
  0xd8   : > { %v610_v9 = vrot.slane %v609_v8, 1 }
  0xda   : > { %v611_v10 = vadd.f32 %v610_v9, %v609_v8 }
  0xdc   : > { %774 = vpush %v611_v10 }
 0x10d   : > { %s775_s5 = spop %774 }
 0x10e   : > { %v613_v11 = vstv %s775_s5 }
 0x10f   : > { %615 = vst.msk [vmem:[%s385_s8] sm:$0x1] %vm614_vm0, %v613_v11 }
 0x11b   : > { %v478_v3 = vpop.trf.xlu0 }
 0x11c   : > { %764 = vmatmul.mubr.msk.f32.vlgmr.msra.gmra.mrb[0].mxu0 %vm494_vm6, %v478_v3 }
 0x1ef   : > { %v564_v12 = vpop.f32.mrb[0].mxu0 }
 0x1f0   : > { %v568_v13 = vadd.f32 %v564_v12, %v461_v2  ;;  %v765_v14 = vpop.f32.mrb[1].mxu0 }
 0x1f2   : > { %570 = vst.msk [vmem:[#allocation2] sm:$0xff] %vm390_vm5, %v568_v13 }
 0x1f9   : > { %v591_v15 = vld [vmem:[#allocation2] sm:$0xff] }
 0x1fa   : > { %592 = vst.msk [vmem:[%s382_s12] sm:$0xff] %vm390_vm5, %v591_v15 }
 0x1fb PF: > { %s15_s17 = sadd.s32 1, %s828_s17   ;;  %s949_s15 = smov %s824_s16 }
 0x1fc   : > { %p12_p6 = scmp.ge.s32.totalorder %s15_s17, 4   ;;  %s950_s16 = smov %s952_s18 }
 0x1fe   :  { %14 = sbr.rel (!%p12_p6) target bundleno = 2 (0x2), region = 88 }

</bundles_post_ra>
